<compile_context>
chip_gen: v7x
topology: tpu7x:2x2x1
jax: 0.10.0
libtpu: 0.0.40
codegen_flags: <defaults>
</compile_context>

<pallas_src>
import functools
import math

import jax
import jax.numpy as jnp
from jax.experimental import pallas as pl
from jax.experimental.pallas import tpu as pltpu


def _round_up(x: int, m: int) -> int:
    return (x + m - 1) // m * m


# ---------------------------------------------------------------------------
# Fast-path kernel: embedding table is VMEM-resident, gather is in-kernel.
# ---------------------------------------------------------------------------
def _resident_gather_kernel(ids_ref, table_ref, o_ref, *, scale, tb):
    # ids_ref  : SMEM (n_pad,) int32  -- whole chunk of token ids
    # table_ref: VMEM (vocab, E)      -- resident (constant index_map)
    # o_ref    : VMEM (tb, E)         -- lane-dense output block for this step
    base = pl.program_id(0) * tb

    def body(t, carry):
        idx = ids_ref[base + t]                       # SMEM scalar read
        row = table_ref[pl.ds(idx, 1), :]             # (1, E) dynamic VMEM row load
        o_ref[pl.ds(t, 1), :] = (row * scale).astype(o_ref.dtype)
        return carry

    jax.lax.fori_loop(0, tb, body, 0)


# ---------------------------------------------------------------------------
# Large-table fallback: manual double-buffered per-row DMA gather from HBM.
# (Not exercised by the small demo below; used when the table cannot be
#  VMEM-resident, e.g. 32K x 1024 bf16 on v7x.)
# ---------------------------------------------------------------------------
def _hbm_gather_kernel(ids_ref, table_hbm, o_ref, rows, sems, *, scale, tb, chunk):
    # rows: VMEM (2, chunk, E) scratch; sems: DMA sems (2, chunk)
    nchunks = tb // chunk
    step_base = pl.program_id(0) * tb

    def row_copy(c, slot, k):
        idx = ids_ref[step_base + c * chunk + k]
        return pltpu.make_async_copy(
            table_hbm.at[pl.ds(idx, 1), :],
            rows.at[slot, pl.ds(k, 1), :],
            sems.at[slot, k],
        )

    def issue(c, slot):
        for k in range(chunk):                 # `chunk` outstanding row DMAs
            row_copy(c, slot, k).start()

    def drain(c, slot):
        for k in range(chunk):
            row_copy(c, slot, k).wait()

    issue(0, 0)

    def chunk_body(c, carry):
        slot = c % 2

        @pl.when(c + 1 < nchunks)              # prefetch next chunk while this drains
        def _():
            issue(c + 1, 1 - slot)

        drain(c, slot)
        obase = pl.multiple_of(c * chunk, chunk)   # sublane-aligned (chunk, E) store
        o_ref[pl.ds(obase, chunk), :] = (rows[slot] * scale).astype(o_ref.dtype)
        return carry

    jax.lax.fori_loop(0, nchunks, chunk_body, 0)


# ---------------------------------------------------------------------------
# One flat-token-chunk call.
# ---------------------------------------------------------------------------
def _embed_flat(ids, table, *, token_block, vmem_budget):
    n = ids.shape[0]
    vocab, emb = table.shape
    out_dtype = table.dtype
    scale = math.sqrt(emb)
    itemsize = jnp.dtype(out_dtype).itemsize
    # Packed-sublane group: 8 (f32) / 16 (bf16) / 32 (int8/fp8) -> unmasked stores.
    sublanes = 8 * max(1, 4 // itemsize)

    tb = min(_round_up(token_block, sublanes), _round_up(n, sublanes))
    n_pad = _round_up(n, tb)
    if n_pad != n:
        ids = jnp.pad(ids, (0, n_pad - n))     # id 0 is a valid row; rows dropped below
    grid = (n_pad // tb,)

    ids_spec = pl.BlockSpec(memory_space=pltpu.MemorySpace.SMEM)  # whole chunk in SMEM
    out_spec = pl.BlockSpec((tb, emb), lambda i: (i, 0))          # lane-dense output

    table_bytes = vocab * emb * jnp.dtype(table.dtype).itemsize
    out_block_bytes = tb * emb * itemsize
    # Budget 2x table (possible double buffering) + 2x output block + slack.
    resident_need = 2 * table_bytes + 2 * out_block_bytes + (1 << 20)

    if resident_need <= vmem_budget:
        # ---- VMEM-resident table path -------------------------------------
        vmem_limit = int(min(vmem_budget, max(resident_need + (2 << 20), 32 << 20)))
        out = pl.pallas_call(
            functools.partial(_resident_gather_kernel, scale=scale, tb=tb),
            out_shape=jax.ShapeDtypeStruct((n_pad, emb), out_dtype),
            grid=grid,
            in_specs=[
                ids_spec,
                # Constant index_map: table DMA'd once, stays resident across steps.
                pl.BlockSpec((vocab, emb), lambda i: (0, 0)),
            ],
            out_specs=out_spec,
            compiler_params=pltpu.CompilerParams(
                dimension_semantics=("parallel",),     # shards steps across v7x TCs
                vmem_limit_bytes=vmem_limit,
            ),
        )(ids, table)
    else:
        # ---- Manual double-buffered HBM row-gather fallback -----------------
        chunk = sublanes                               # divides tb by construction
        out = pl.pallas_call(
            functools.partial(_hbm_gather_kernel, scale=scale, tb=tb, chunk=chunk),
            out_shape=jax.ShapeDtypeStruct((n_pad, emb), out_dtype),
            grid=grid,
            in_specs=[ids_spec, pl.BlockSpec(memory_space=pl.ANY)],
            out_specs=out_spec,
            scratch_shapes=[
                pltpu.VMEM((2, chunk, emb), table.dtype),
                pltpu.SemaphoreType.DMA((2, chunk)),
            ],
            compiler_params=pltpu.CompilerParams(
                dimension_semantics=("parallel",),
            ),
        )(ids, table)

    return out[:n]


# ---------------------------------------------------------------------------
# Public wrapper: TokenEmbedding.forward
# ---------------------------------------------------------------------------
def token_embedding(tokens, embedding_table, *, token_block=256,
                    max_tokens_per_call=32768, max_vmem_fraction=0.75):
    """tokens: integer array of any shape; embedding_table: (vocab, E).

    Returns embedding_table[tokens] * sqrt(E) with shape tokens.shape + (E,).
    """
    vocab, emb = embedding_table.shape
    tok_shape = tokens.shape

    ids = tokens.reshape(-1).astype(jnp.int32)         # mirrors tokens.long()
    # TODO(synk): PyTorch raises on out-of-range ids; we clamp instead of faulting a DMA.
    ids = jnp.clip(ids, 0, vocab - 1)
    n = ids.shape[0]
    if n == 0:
        return jnp.zeros((*tok_shape, emb), dtype=embedding_table.dtype)

    try:
        vmem_cap = int(pltpu.get_tpu_info().vmem_capacity_bytes)
    except Exception:
        vmem_cap = 64 << 20        # v7x per-core VMEM (smallest current generation)
    vmem_budget = int(vmem_cap * max_vmem_fraction)

    embed = functools.partial(_embed_flat, table=embedding_table,
                              token_block=token_block, vmem_budget=vmem_budget)

    if n <= max_tokens_per_call:
        out_flat = embed(ids)
    else:
        # Chunk very long token streams so the 1-D ids SMEM footprint stays bounded
        # (1-D SMEM arrays pad to the next power-of-two bytes).
        out_flat = jnp.concatenate(
            [embed(ids[s:s + max_tokens_per_call])
             for s in range(0, n, max_tokens_per_call)],
            axis=0)

    return out_flat.reshape(*tok_shape, emb)


# ---------------------------------------------------------------------------
# Demo / correctness check
# ---------------------------------------------------------------------------
if __name__ == "__main__":
    VOCAB, EMB = 128, 128          # EMB multiple of 128 -> lane-dense stores
    SEQ, BATCH = 8, 2              # seq-first layout, matching the transformer usage

    key = jax.random.PRNGKey(0)
    k_tok, k_tok2, k_emb = jax.random.split(key, 3)

    tokens = jax.random.randint(k_tok, (SEQ, BATCH), 0, VOCAB, dtype=jnp.int32)
    # nn.Embedding default init: weights ~ N(0, 1)
    table = jax.random.normal(k_emb, (VOCAB, EMB), dtype=jnp.float32)

    out = token_embedding(tokens, table)
    out = jax.block_until_ready(out)
    ref = table[tokens] * math.sqrt(EMB)
    assert out.shape == (SEQ, BATCH, EMB)
    assert jnp.allclose(out, ref, atol=1e-6, rtol=1e-6)

    # Second check: multi-step grid + padding drop (65 tokens, 64-token blocks).
    tokens2 = jax.random.randint(k_tok2, (13, 5), 0, VOCAB, dtype=jnp.int32)
    out2 = jax.block_until_ready(token_embedding(tokens2, table, token_block=64))
    ref2 = table[tokens2] * math.sqrt(EMB)
    assert out2.shape == (13, 5, EMB)
    assert jnp.allclose(out2, ref2, atol=1e-6, rtol=1e-6)

    print("KERNEL_OK")
</pallas_src>

<mosaic_0001>
module attributes {stable_mosaic.version = 11 : i64} {
  func.func @_resident_gather_kernel(%arg0: i32, %arg1: memref<16xi32, #tpu.memory_space<smem>>, %arg2: memref<128x128xf32, #tpu.memory_space<vmem>>, %arg3: memref<16x128xf32, #tpu.memory_space<vmem>>) attributes {dimension_semantics = [#tpu.dimension_semantics<parallel>], iteration_bounds = array<i64: 1>, scalar_prefetch = 0 : i64, scratch_operands = 0 : i64, tpu.core_type = #tpu.core_type<tc>, window_params = [{transform_indices = @transform_0, window_bounds = array<i64: 16>}, {pipeline_mode = #tpu.pipeline_mode<synchronous>, transform_indices = @transform_1, window_bounds = array<i64: 128, 128>}, {transform_indices = @transform_2, window_bounds = array<i64: 16, 128>}]} {
    %c16_i32 = arith.constant 16 : i32
    %0 = arith.muli %arg0, %c16_i32 : i32
    %c0_i32 = arith.constant 0 : i32
    %c16_i32_0 = arith.constant 16 : i32
    %1 = arith.addi %c0_i32, %c16_i32_0 : i32
    %c1_i32 = arith.constant 1 : i32
    scf.for %arg4 = %c0_i32 to %1 step %c1_i32  : i32 {
      %2 = arith.addi %0, %arg4 : i32
      %3 = arith.index_cast %2 : i32 to index
      %4 = memref.load %arg1[%3] : memref<16xi32, #tpu.memory_space<smem>>
      %5 = arith.index_cast %4 : i32 to index
      %c0 = arith.constant 0 : index
      %6 = vector.load %arg2[%5, %c0] : memref<128x128xf32, #tpu.memory_space<vmem>>, vector<1x128xf32>
      %cst = arith.constant 11.3137083 : f32
      %7 = vector.broadcast %cst : f32 to vector<1x128xf32>
      %8 = arith.mulf %6, %7 : vector<1x128xf32>
      %9 = arith.index_cast %arg4 : i32 to index
      %c0_2 = arith.constant 0 : index
      %10 = vector.load %arg3[%9, %c0_2] : memref<16x128xf32, #tpu.memory_space<vmem>>, vector<1x128xf32>
      tpu.vector_store %arg3[%9, %c0_2], %8 {strides = array<i32>} : memref<16x128xf32, #tpu.memory_space<vmem>>, vector<1x128xf32>,
    }
    %c16_i32_1 = arith.constant 16 : i32
    return
  }
  func.func @transform_0(%arg0: i32) -> i32 {
    %c0_i32 = arith.constant 0 : i32
    %c0_i32_0 = arith.constant 0 : i32
    return %c0_i32 : i32
  }
  func.func @transform_1(%arg0: i32) -> (i32, i32) {
    %c0_i32 = arith.constant 0 : i32
    %c0_i32_0 = arith.constant 0 : i32
    %c0_i32_1 = arith.constant 0 : i32
    return %c0_i32, %c0_i32_0 : i32, i32
  }
  func.func @transform_2(%arg0: i32) -> (i32, i32) {
    %c0_i32 = arith.constant 0 : i32
    %c0_i32_0 = arith.constant 0 : i32
    return %arg0, %c0_i32 : i32, i32
  }
}

</mosaic_0001>

<bundles_post_ra>
// kernel: tpu_custom_call.1
= control target key start
LH: loop header
LB: loop body
LE: loop exit
PB: predicated region body
PF: predicated region fallthrough
CT: control target
= control target key end

     0   :  { %7 = vsyncpa [#allocation5], 0  ;;  %s219_s0 = inlined_call_operand.hbm [shape: s32[16], index: 0, kind: input, shape index: {}]   ;;  %s220_s1 = inlined_call_operand.hbm [shape: f32[128,128], index: 1, kind: input, shape index: {}]   ;;  %s221_s2 = inlined_call_operand.hbm [shape: f32[16,128], index: 2, kind: output, shape index: {}]  }
   0x1   :  { %8 = vsyncpa [#allocation3], 0 }
   0x2   :  { %9 = vsyncpa [#allocation4], 0  ;;  %s89_s11 = scalar_lea.hbm %s219_s0, 16 }
   0x3   :  { %p90_p0 = scmp.ne.s32.totalorder %s219_s0, %s89_s11  ;;  %p93_p1 = scmp.lt.u32.totalorder %s89_s11, %s219_s0 }
   0x5   :  { %p95_p2 = pnand %p93_p1, %p90_p0 }
   0x7   :  { %98 = shalt.err (!%p95_p2)
}
   0x8   :  { %s157_s16 = smov [#allocation2]   ;;  %s158_s19 = smov [#allocation6]  }
   0x9   :  { %17 = dma.hbm_to_smem %s219_s0, 16, %s157_s16, [#allocation5]  }
   0xa   :  { %s23_s20 = sshll.u32 %s158_s19, 4  ;;  %s99_s23 = scalar_lea.hbm %s220_s1, 2048  ;;  %s24_s20 = int_to_ptr.vmem [resolvable:$true] %s23_s20 }
   0xb   :  { %p100_p3 = scmp.ne.s32.totalorder %s220_s1, %s99_s23  ;;  %p103_p4 = scmp.lt.u32.totalorder %s99_s23, %s220_s1 }
   0xd   :  { %p105_p5 = pnand %p103_p4, %p100_p3 }
   0xf   :  { %108 = shalt.err (!%p105_p5)
}
  0x10   :  { %s109_s28 = scalar_lea.vmem %s24_s20, 2048  ;;  %p114_p7 = scmp.lt.s32.totalorder %s24_s20, %s24_s20 }
  0x11   :  { %p110_p6 = scmp.ne.s32.totalorder %s24_s20, %s109_s28  ;;  %p115_p8 = scmp.lt.s32.totalorder %s109_s28, %s109_s28 }
  0x13   :  { %p116_p9 = por %p115_p8, %p114_p7 }
  0x15   :  { %p117_p10 = pnand %p116_p9, %p110_p6 }
  0x17   :  { %120 = shalt.err (!%p117_p10)
}
  0x18   :  { %s159_s0 = smov 128   ;;  %s160_s29 = smov 8  }
  0x19   :  { %29 = dma.hbm_to_vmem [thread:$0]  %s220_s1, 2048, %s24_s20, [#allocation3], %s159_s0, %s159_s0, %s160_s29  }
  0x1a   :  { %147 = dma.done.wait [#allocation5], 16  }
  0x1b   :  { %148 = vsyncadd [#allocation5], 4294967280 }
  0x1c   :  { %149 = dma.done.wait [#allocation3], 2048  }
  0x1d   :  { %150 = vsyncadd [#allocation3], 4294965248 }
  0x1e   :  { %36 = sfence }
  0x1f   :  { %s153_s4 = smov 0  }
  0x20 LB: > { %s45_s5 = sld [smem:[#allocation2 + %s155_s4]]  ;;  %s49_s7 = scalar_lea.vmem [#allocation7], %s155_s4  ;;  %s155_s4 = sphi %s153_s4, %s43_s4  }
  0x21   : > { %s43_s4 = sadd.s32 1, %s155_s4  }
  0x22   : > { %p40_p11 = scmp.ge.s32.totalorder %s43_s4, 16  }
  0x23   :  { %s161_s1 = smov (%p40_p11), [#allocation7]  }
  0x24   :  { %42 = sbr.rel (!%p40_p11) target bundleno = 32 (0x20), region = 45  ;;  %s56_s8 = sshll.u32 (%p40_p11), %s161_s1, 4  ;;  %s57_s8 = int_to_ptr.vmem [resolvable:$true] %s56_s8 }
  0x25   :  { %s121_s9 = scalar_lea.vmem (%p40_p11), %s57_s8, 256  ;;  %p126_p13 = scmp.lt.s32.totalorder (%p40_p11), %s57_s8, %s57_s8 }
  0x26   : > { %s46_s6 = scalar_lea.vmem [#allocation6], %s45_s5  ;;  %p122_p12 = scmp.ne.s32.totalorder (%p40_p11), %s57_s8, %s121_s9 }
  0x27   : > { %v47_v0 = vld [vmem:[%s46_s6] sm:$0x1]  ;;  %p127_p0 = scmp.lt.s32.totalorder (%p40_p11), %s121_s9, %s121_s9 }
  0x28   : > { %v48_v1 = vmul.f32 11.313708, %v47_v0 }
  0x29   :  { %p128_p1 = por (%p40_p11), %p127_p0, %p126_p13 }
  0x2a   : > { %50 = vst [vmem:[%s49_s7] sm:$0x1] %v48_v1 }
  0x2b   :  { %p129_p2 = pnand %p128_p1, %p122_p12 }
  0x2d   :  { %132 = shalt.err (!%p129_p2)
}
  0x2e   :  { %s133_s12 = scalar_lea.hbm %s221_s2, 256 }
  0x2f   :  { %p134_p3 = scmp.ne.s32.totalorder %s221_s2, %s133_s12  ;;  %p137_p4 = scmp.lt.u32.totalorder %s133_s12, %s221_s2 }
  0x31   :  { %p139_p5 = pnand %p137_p4, %p134_p3 }
  0x33   :  { %142 = shalt.err (!%p139_p5)
}
  0x34   :  { %62 = dma.vmem_to_hbm [thread:$0]  %s57_s8, 256, %s221_s2, [#allocation4], %s159_s0, %s159_s0, %s160_s29  }
  0x35   :  { %151 = dma.done.wait [#allocation4], 256  }
  0x36   :  { %152 = vsyncadd [#allocation4], 4294967040 }
  0x37   :  { %66 = vsyncpa [#allocation3], 1 }
  0x38   :  { %67 = vsyncpa [#allocation4], 1 }
  0x39   :  { %68 = vsyncpa [#allocation5], 1 }

</bundles_post_ra>
